<compile_context>
chip_gen: v6e
topology: v6e:2x2x1
jax: 0.10.0
libtpu: 0.0.40
codegen_flags: <defaults>
</compile_context>

<pallas_src>
import jax
import jax.numpy as jnp
from jax.experimental import pallas as pl
from jax.experimental.pallas import tpu as pltpu


# ----------------------------------------------------------------------------
# helpers
# ----------------------------------------------------------------------------
def _layernorm(x, g, b, eps=1e-5):
    # PyTorch LayerNorm: biased variance, eps inside sqrt. f32 math.
    mu = jnp.mean(x, axis=-1, keepdims=True)
    var = jnp.mean((x - mu) ** 2, axis=-1, keepdims=True)
    return (x - mu) * jax.lax.rsqrt(var + eps) * g + b


def _row_tile(total, cap=512):
    """Largest row-tile <= cap that divides `total` (multiple of 8), else full."""
    if total <= cap:
        return total
    t = cap - cap % 8
    while t >= 8:
        if total % t == 0:
            return t
        t -= 8
    return total


def _const_spec(shape):
    return pl.BlockSpec(shape, lambda *_: (0,) * len(shape))


# ----------------------------------------------------------------------------
# Kernel 1: patch embedding  (LN -> Linear -> LN -> + pos embedding)
# ----------------------------------------------------------------------------
def patch_embed_kernel(p_ref, ln1g_ref, ln1b_ref, w_ref, b_ref,
                       ln2g_ref, ln2b_ref, pos_ref, out_ref):
    x = _layernorm(p_ref[...], ln1g_ref[...], ln1b_ref[...])          # f32
    x = jnp.dot(x.astype(jnp.bfloat16), w_ref[...],
                preferred_element_type=jnp.float32) + b_ref[...]
    x = _layernorm(x, ln2g_ref[...], ln2b_ref[...])
    out_ref[...] = x + pos_ref[...]


def patch_embed_call(patches2d, params, pos):
    BN, PD = patches2d.shape
    N, Denc = pos.shape
    B = BN // N
    return pl.pallas_call(
        patch_embed_kernel,
        out_shape=jax.ShapeDtypeStruct((BN, Denc), jnp.float32),
        grid=(B,),
        in_specs=[
            pl.BlockSpec((N, PD), lambda b: (b, 0)),
            _const_spec((1, PD)), _const_spec((1, PD)),
            _const_spec((PD, Denc)), _const_spec((1, Denc)),
            _const_spec((1, Denc)), _const_spec((1, Denc)),
            _const_spec((N, Denc)),                      # pos stays resident
        ],
        out_specs=pl.BlockSpec((N, Denc), lambda b: (b, 0)),
        compiler_params=pltpu.CompilerParams(dimension_semantics=("parallel",)),
    )(patches2d,
      params['pe_ln1_g'], params['pe_ln1_b'],
      params['pe_w'], params['pe_b'],
      params['pe_ln2_g'], params['pe_ln2_b'], pos)


# ----------------------------------------------------------------------------
# Kernel 2a: multi-head self-attention (per batch element), pre output-proj
# ----------------------------------------------------------------------------
def mha_kernel(x_ref, wq_ref, wk_ref, wv_ref, bq_ref, bk_ref, bv_ref, out_ref):
    x = x_ref[0]                                    # (S, D) f32
    xb = x.astype(jnp.bfloat16)
    H, _, hd = wq_ref.shape
    scale = 1.0 / float(hd) ** 0.5

    heads = []
    for h in range(H):                              # static loop over heads
        qh = (jnp.dot(xb, wq_ref[h], preferred_element_type=jnp.float32)
              + bq_ref[h]) * scale                  # (S, hd) f32
        kh = jnp.dot(xb, wk_ref[h], preferred_element_type=jnp.float32) + bk_ref[h]
        vh = jnp.dot(xb, wv_ref[h], preferred_element_type=jnp.float32) + bv_ref[h]
        s = jax.lax.dot_general(qh.astype(jnp.bfloat16), kh.astype(jnp.bfloat16),
                                (((1,), (1,)), ((), ())),
                                preferred_element_type=jnp.float32)    # (S, S)
        s = s - jnp.max(s, axis=-1, keepdims=True)                     # f32 softmax
        e = jnp.exp(s)
        p = e * pl.reciprocal(jnp.sum(e, axis=-1, keepdims=True), approx=True)
        heads.append(jnp.dot(p.astype(jnp.bfloat16), vh.astype(jnp.bfloat16),
                             preferred_element_type=jnp.float32))
    out_ref[0] = jnp.concatenate(heads, axis=-1)    # (S, D), single full store


def mha_call(x, lp):
    B, S, D = x.shape
    H, _, hd = lp['wq'].shape
    return pl.pallas_call(
        mha_kernel,
        out_shape=jax.ShapeDtypeStruct((B, S, D), jnp.float32),
        grid=(B,),
        in_specs=[
            pl.BlockSpec((1, S, D), lambda b: (b, 0, 0)),
            _const_spec((H, D, hd)), _const_spec((H, D, hd)), _const_spec((H, D, hd)),
            _const_spec((H, 1, hd)), _const_spec((H, 1, hd)), _const_spec((H, 1, hd)),
        ],
        out_specs=pl.BlockSpec((1, S, D), lambda b: (b, 0, 0)),
        compiler_params=pltpu.CompilerParams(dimension_semantics=("parallel",)),
    )(x, lp['wq'], lp['wk'], lp['wv'], lp['bq'], lp['bk'], lp['bv'])


# ----------------------------------------------------------------------------
# Kernel 2b: attention output-proj + residual + LN1 + FFN + residual + LN2
#            (B folded into the M dimension; row-tiled grid)
# ----------------------------------------------------------------------------
def proj_ffn_kernel(attn_ref, x_ref, wo_ref, bo_ref, ln1g_ref, ln1b_ref,
                    w1_ref, b1_ref, w2_ref, b2_ref, ln2g_ref, ln2b_ref,
                    out_ref):
    a = jnp.dot(attn_ref[...].astype(jnp.bfloat16), wo_ref[...],
                preferred_element_type=jnp.float32) + bo_ref[...]
    x1 = _layernorm(x_ref[...] + a, ln1g_ref[...], ln1b_ref[...])      # norm1
    h = jnp.dot(x1.astype(jnp.bfloat16), w1_ref[...],
                preferred_element_type=jnp.float32) + b1_ref[...]
    h = jnp.maximum(h, 0.0)                                            # relu
    h = jnp.dot(h.astype(jnp.bfloat16), w2_ref[...],
                preferred_element_type=jnp.float32) + b2_ref[...]
    out_ref[...] = _layernorm(x1 + h, ln2g_ref[...], ln2b_ref[...])    # norm2


def proj_ffn_call(attn2d, x2d, lp):
    M, D = x2d.shape
    F = lp['w1'].shape[1]
    TM = _row_tile(M)
    nt = M // TM
    row = lambda cols: pl.BlockSpec((TM, cols), lambda i: (i, 0))
    return pl.pallas_call(
        proj_ffn_kernel,
        out_shape=jax.ShapeDtypeStruct((M, D), jnp.float32),
        grid=(nt,),
        in_specs=[
            row(D), row(D),
            _const_spec((D, D)), _const_spec((1, D)),
            _const_spec((1, D)), _const_spec((1, D)),
            _const_spec((D, F)), _const_spec((1, F)),
            _const_spec((F, D)), _const_spec((1, D)),
            _const_spec((1, D)), _const_spec((1, D)),
        ],
        out_specs=row(D),
        compiler_params=pltpu.CompilerParams(dimension_semantics=("parallel",)),
    )(attn2d, x2d, lp['wo'], lp['bo'], lp['ln1_g'], lp['ln1_b'],
      lp['w1'], lp['b1'], lp['w2'], lp['b2'], lp['ln2_g'], lp['ln2_b'])


def transformer_layer_call(x, lp):
    """One nn.TransformerEncoderLayer (post-norm, batch_first, relu)."""
    B, S, D = x.shape
    attn = mha_call(x, lp)                                   # (B, S, D)
    y = proj_ffn_call(attn.reshape(B * S, D), x.reshape(B * S, D), lp)
    return y.reshape(B, S, D)


# ----------------------------------------------------------------------------
# Kernel 3: to_pixels linear fused with MSE-sum reduction (row-tiled)
# ----------------------------------------------------------------------------
def pixel_loss_kernel(tok_ref, w_ref, b_ref, tgt_ref, out_ref, acc_ref):
    i = pl.program_id(0)

    @pl.when(i == 0)
    def _():
        acc_ref[0, 0] = 0.0

    pred = jnp.dot(tok_ref[...].astype(jnp.bfloat16), w_ref[...],
                   preferred_element_type=jnp.float32) + b_ref[...]
    diff = pred - tgt_ref[...]
    acc_ref[0, 0] += jnp.sum(diff * diff)

    @pl.when(i == pl.num_programs(0) - 1)
    def _():
        out_ref[0, 0] = acc_ref[0, 0]


def pixel_loss_call(tok2d, wpix, bpix, tgt2d):
    R, Ddec = tok2d.shape
    PD = tgt2d.shape[1]
    TM = _row_tile(R)
    nt = R // TM
    return pl.pallas_call(
        pixel_loss_kernel,
        out_shape=jax.ShapeDtypeStruct((1, 1), jnp.float32),
        grid=(nt,),
        in_specs=[
            pl.BlockSpec((TM, Ddec), lambda i: (i, 0)),
            _const_spec((Ddec, PD)), _const_spec((1, PD)),
            pl.BlockSpec((TM, PD), lambda i: (i, 0)),
        ],
        out_specs=pl.BlockSpec(memory_space=pltpu.MemorySpace.SMEM),
        scratch_shapes=[pltpu.SMEM((1, 1), jnp.float32)],
        compiler_params=pltpu.CompilerParams(dimension_semantics=("arbitrary",)),
    )(tok2d, wpix, bpix, tgt2d)


# ----------------------------------------------------------------------------
# Parameter init (deterministic, synthetic).  Matmul weights stored in bf16
# (MXU-native, halves weight DMA); biases / LN / embeddings stay f32.
# ----------------------------------------------------------------------------
def init_params(key, *, C, patch, N, Denc, Ddec, enc_layers, dec_layers,
                enc_ff, dec_ff, heads):
    PD = patch * patch * C
    keys = iter(jax.random.split(key, 128))
    bf16 = jnp.bfloat16

    def nrm(shape, scale=0.02, dtype=jnp.float32):
        return (scale * jax.random.normal(next(keys), shape)).astype(dtype)

    def layer(D, F):
        hd = D // heads
        return dict(
            wq=nrm((heads, D, hd), dtype=bf16),
            wk=nrm((heads, D, hd), dtype=bf16),
            wv=nrm((heads, D, hd), dtype=bf16),
            bq=jnp.zeros((heads, 1, hd), jnp.float32),
            bk=jnp.zeros((heads, 1, hd), jnp.float32),
            bv=jnp.zeros((heads, 1, hd), jnp.float32),
            wo=nrm((D, D), dtype=bf16), bo=jnp.zeros((1, D), jnp.float32),
            ln1_g=jnp.ones((1, D), jnp.float32), ln1_b=jnp.zeros((1, D), jnp.float32),
            w1=nrm((D, F), dtype=bf16), b1=jnp.zeros((1, F), jnp.float32),
            w2=nrm((F, D), dtype=bf16), b2=jnp.zeros((1, D), jnp.float32),
            ln2_g=jnp.ones((1, D), jnp.float32), ln2_b=jnp.zeros((1, D), jnp.float32),
        )

    return dict(
        pe_ln1_g=jnp.ones((1, PD), jnp.float32), pe_ln1_b=jnp.zeros((1, PD), jnp.float32),
        pe_w=nrm((PD, Denc), dtype=bf16), pe_b=jnp.zeros((1, Denc), jnp.float32),
        pe_ln2_g=jnp.ones((1, Denc), jnp.float32), pe_ln2_b=jnp.zeros((1, Denc), jnp.float32),
        pos_embedding=nrm((1, N + 1, Denc), 1.0),
        encoder_layers=[layer(Denc, enc_ff) for _ in range(enc_layers)],
        decoder_layers=[layer(Ddec, dec_ff) for _ in range(dec_layers)],
        mask_token=nrm((Ddec,), 1.0),
        dec_pos_emb=nrm((N, Ddec), 1.0),
        pix_w=nrm((Ddec, PD), dtype=bf16), pix_b=jnp.zeros((1, PD), jnp.float32),
    )


# ----------------------------------------------------------------------------
# MAE forward
# ----------------------------------------------------------------------------
def mae_forward(x, params, mask_key, *, patch, masking_ratio=0.75,
                return_encoder=False):
    B, C, H, W = x.shape
    p1 = p2 = patch
    h, w = H // p1, W // p2
    N = h * w
    PD = p1 * p2 * C
    Denc = params['pe_w'].shape[1]
    Ddec = params['dec_pos_emb'].shape[1]

    # patchify: 'b c (h p1) (w p2) -> b (h w) (p1 p2 c)'
    patches = x.reshape(B, C, h, p1, w, p2).transpose(0, 2, 4, 3, 5, 1)
    patches = patches.reshape(B, N, PD)

    # --- patch embedding + positional embedding (Pallas kernel 1) ---
    pos = params['pos_embedding'][0, 1:N + 1]                 # (N, Denc)
    tokens = patch_embed_call(patches.reshape(B * N, PD), params, pos)
    tokens = tokens.reshape(B, N, Denc)

    # --- random masking (glue) ---
    num_masked = int(masking_ratio * N)
    rand = jax.random.uniform(mask_key, (B, N))
    rand_indices = jnp.argsort(rand, axis=-1)
    masked_idx = rand_indices[:, :num_masked]                 # (B, nm)
    unmasked_idx = rand_indices[:, num_masked:]               # (B, N-nm)
    batch_range = jnp.arange(B)[:, None]

    tokens_u = jnp.take_along_axis(tokens, unmasked_idx[..., None], axis=1)
    masked_patches = jnp.take_along_axis(patches, masked_idx[..., None], axis=1)

    # --- encoder (Pallas kernels 2a/2b, 2 layers) ---
    enc = tokens_u
    for lp in params['encoder_layers']:
        enc = transformer_layer_call(enc, lp)
    encoded_tokens = enc

    # --- enc_to_dec is Identity (encoder_dim == decoder_dim) ---
    dec_tok_u = encoded_tokens + jnp.take(params['dec_pos_emb'], unmasked_idx, axis=0)
    mask_tok = (params['mask_token'][None, None, :]
                + jnp.take(params['dec_pos_emb'], masked_idx, axis=0))

    dec_in = jnp.zeros((B, N, Ddec), jnp.float32)
    dec_in = dec_in.at[batch_range, unmasked_idx].set(dec_tok_u)
    dec_in = dec_in.at[batch_range, masked_idx].set(mask_tok)

    # --- decoder (Pallas kernels 2a/2b, 2 layers) ---
    dec = dec_in
    for lp in params['decoder_layers']:
        dec = transformer_layer_call(dec, lp)

    # --- to_pixels + MSE reduction (Pallas kernel 3) ---
    mask_tokens_out = jnp.take_along_axis(dec, masked_idx[..., None], axis=1)
    loss_sum = pixel_loss_call(mask_tokens_out.reshape(B * num_masked, Ddec),
                               params['pix_w'], params['pix_b'],
                               masked_patches.reshape(B * num_masked, PD))
    weight_sum = jnp.float32(B * num_masked * PD)             # weights are all ones
    losses = {'mae_loss': loss_sum[0, 0] / (weight_sum + 1e-6)}
    return (losses, encoded_tokens) if return_encoder else losses


# ----------------------------------------------------------------------------
if __name__ == "__main__":
    key = jax.random.PRNGKey(0)
    kx, kp, km = jax.random.split(key, 3)

    B, C, H, W = 2, 4, 16, 16
    PATCH = 2                      # -> num_patches = 64, patch_dim = 16
    N = (H // PATCH) * (W // PATCH)
    ENC_DIM = DEC_DIM = 32
    HEADS = 4

    params = init_params(kp, C=C, patch=PATCH, N=N, Denc=ENC_DIM, Ddec=DEC_DIM,
                         enc_layers=2, dec_layers=2,
                         enc_ff=2048,            # nn.TransformerEncoderLayer default
                         dec_ff=DEC_DIM * 4,     # decoder uses dim_feedforward = 4*dim
                         heads=HEADS)

    x = jax.random.normal(kx, (B, C, H, W), jnp.float32)

    losses, encoded = mae_forward(x, params, km, patch=PATCH,
                                  masking_ratio=0.75, return_encoder=True)
    jax.block_until_ready(losses['mae_loss'])
    jax.block_until_ready(encoded)
    assert bool(jnp.isfinite(losses['mae_loss']))
    print("KERNEL_OK")
</pallas_src>

<mosaic_0001>
module attributes {stable_mosaic.version = 11 : i64} {
  func.func @patch_embed_kernel(%arg0: i32, %arg1: memref<64x16xf32, #tpu.memory_space<vmem>>, %arg2: memref<1x16xf32, #tpu.memory_space<vmem>>, %arg3: memref<1x16xf32, #tpu.memory_space<vmem>>, %arg4: memref<16x32xbf16, #tpu.memory_space<vmem>>, %arg5: memref<1x32xf32, #tpu.memory_space<vmem>>, %arg6: memref<1x32xf32, #tpu.memory_space<vmem>>, %arg7: memref<1x32xf32, #tpu.memory_space<vmem>>, %arg8: memref<64x32xf32, #tpu.memory_space<vmem>>, %arg9: memref<64x32xf32, #tpu.memory_space<vmem>>) attributes {dimension_semantics = [#tpu.dimension_semantics<parallel>], iteration_bounds = array<i64: 2>, scalar_prefetch = 0 : i64, scratch_operands = 0 : i64, tpu.core_type = #tpu.core_type<tc>, window_params = [{transform_indices = @transform_0, window_bounds = array<i64: 64, 16>}, {pipeline_mode = #tpu.pipeline_mode<synchronous>, transform_indices = @transform_1, window_bounds = array<i64: 1, 16>}, {pipeline_mode = #tpu.pipeline_mode<synchronous>, transform_indices = @transform_2, window_bounds = array<i64: 1, 16>}, {pipeline_mode = #tpu.pipeline_mode<synchronous>, transform_indices = @transform_3, window_bounds = array<i64: 16, 32>}, {pipeline_mode = #tpu.pipeline_mode<synchronous>, transform_indices = @transform_4, window_bounds = array<i64: 1, 32>}, {pipeline_mode = #tpu.pipeline_mode<synchronous>, transform_indices = @transform_5, window_bounds = array<i64: 1, 32>}, {pipeline_mode = #tpu.pipeline_mode<synchronous>, transform_indices = @transform_6, window_bounds = array<i64: 1, 32>}, {pipeline_mode = #tpu.pipeline_mode<synchronous>, transform_indices = @transform_7, window_bounds = array<i64: 64, 32>}, {transform_indices = @transform_8, window_bounds = array<i64: 64, 32>}]} {
    %c0 = arith.constant 0 : index
    %c0_0 = arith.constant 0 : index
    %0 = vector.load %arg1[%c0, %c0_0] : memref<64x16xf32, #tpu.memory_space<vmem>>, vector<64x16xf32>
    %c0_1 = arith.constant 0 : index
    %c0_2 = arith.constant 0 : index
    %1 = vector.load %arg2[%c0_1, %c0_2] : memref<1x16xf32, #tpu.memory_space<vmem>>, vector<1x16xf32>
    %c0_3 = arith.constant 0 : index
    %c0_4 = arith.constant 0 : index
    %2 = vector.load %arg3[%c0_3, %c0_4] : memref<1x16xf32, #tpu.memory_space<vmem>>, vector<1x16xf32>
    %cst = arith.constant dense<0.000000e+00> : vector<64xf32>
    %3 = vector.multi_reduction <add>, %0, %cst [1] : vector<64x16xf32> to vector<64xf32>
    %4 = vector.shape_cast %3 : vector<64xf32> to vector<64x1xf32>
    %cst_5 = arith.constant 1.600000e+01 : f32
    %5 = vector.broadcast %cst_5 : f32 to vector<64x1xf32>
    %6 = arith.divf %4, %5 : vector<64x1xf32>
    %7 = vector.broadcast %6 : vector<64x1xf32> to vector<64x16xf32>
    %8 = arith.subf %0, %7 : vector<64x16xf32>
    %9 = arith.mulf %8, %8 : vector<64x16xf32>
    %cst_6 = arith.constant dense<0.000000e+00> : vector<64xf32>
    %10 = vector.multi_reduction <add>, %9, %cst_6 [1] : vector<64x16xf32> to vector<64xf32>
    %11 = vector.shape_cast %10 : vector<64xf32> to vector<64x1xf32>
    %cst_7 = arith.constant 1.600000e+01 : f32
    %12 = vector.broadcast %cst_7 : f32 to vector<64x1xf32>
    %13 = arith.divf %11, %12 : vector<64x1xf32>
    %14 = vector.broadcast %6 : vector<64x1xf32> to vector<64x16xf32>
    %15 = arith.subf %0, %14 : vector<64x16xf32>
    %cst_8 = arith.constant 9.99999974E-6 : f32
    %16 = vector.broadcast %cst_8 : f32 to vector<64x1xf32>
    %17 = arith.addf %13, %16 : vector<64x1xf32>
    %18 = math.rsqrt %17 : vector<64x1xf32>
    %19 = vector.broadcast %18 : vector<64x1xf32> to vector<64x16xf32>
    %20 = arith.mulf %15, %19 : vector<64x16xf32>
    %21 = vector.broadcast %1 : vector<1x16xf32> to vector<64x16xf32>
    %22 = arith.mulf %20, %21 : vector<64x16xf32>
    %23 = vector.broadcast %2 : vector<1x16xf32> to vector<64x16xf32>
    %24 = arith.addf %22, %23 : vector<64x16xf32>
    %25 = arith.truncf %24 : vector<64x16xf32> to vector<64x16xbf16>
    %c0_9 = arith.constant 0 : index
    %c0_10 = arith.constant 0 : index
    %26 = vector.load %arg4[%c0_9, %c0_10] : memref<16x32xbf16, #tpu.memory_space<vmem>>, vector<16x32xbf16>
    %cst_11 = arith.constant dense<0.000000e+00> : vector<64x32xf32>
    %27 = tpu.matmul %25, %26, %cst_11 {dimension_numbers = #tpu.dot_dimension_numbers<[1], [0], [0], [1], [0, 0, 1, 1], [], []>} : vector<64x16xbf16>, vector<16x32xbf16>, vector<64x32xf32> -> vector<64x32xf32>
    %c0_12 = arith.constant 0 : index
    %c0_13 = arith.constant 0 : index
    %28 = vector.load %arg5[%c0_12, %c0_13] : memref<1x32xf32, #tpu.memory_space<vmem>>, vector<1x32xf32>
    %29 = vector.broadcast %28 : vector<1x32xf32> to vector<64x32xf32>
    %30 = arith.addf %27, %29 : vector<64x32xf32>
    %c0_14 = arith.constant 0 : index
    %c0_15 = arith.constant 0 : index
    %31 = vector.load %arg6[%c0_14, %c0_15] : memref<1x32xf32, #tpu.memory_space<vmem>>, vector<1x32xf32>
    %c0_16 = arith.constant 0 : index
    %c0_17 = arith.constant 0 : index
    %32 = vector.load %arg7[%c0_16, %c0_17] : memref<1x32xf32, #tpu.memory_space<vmem>>, vector<1x32xf32>
    %cst_18 = arith.constant dense<0.000000e+00> : vector<64xf32>
    %33 = vector.multi_reduction <add>, %30, %cst_18 [1] : vector<64x32xf32> to vector<64xf32>
    %34 = vector.shape_cast %33 : vector<64xf32> to vector<64x1xf32>
    %cst_19 = arith.constant 3.200000e+01 : f32
    %35 = vector.broadcast %cst_19 : f32 to vector<64x1xf32>
    %36 = arith.divf %34, %35 : vector<64x1xf32>
    %37 = vector.broadcast %36 : vector<64x1xf32> to vector<64x32xf32>
    %38 = arith.subf %30, %37 : vector<64x32xf32>
    %39 = arith.mulf %38, %38 : vector<64x32xf32>
    %cst_20 = arith.constant dense<0.000000e+00> : vector<64xf32>
    %40 = vector.multi_reduction <add>, %39, %cst_20 [1] : vector<64x32xf32> to vector<64xf32>
    %41 = vector.shape_cast %40 : vector<64xf32> to vector<64x1xf32>
    %cst_21 = arith.constant 3.200000e+01 : f32
    %42 = vector.broadcast %cst_21 : f32 to vector<64x1xf32>
    %43 = arith.divf %41, %42 : vector<64x1xf32>
    %44 = vector.broadcast %36 : vector<64x1xf32> to vector<64x32xf32>
    %45 = arith.subf %30, %44 : vector<64x32xf32>
    %cst_22 = arith.constant 9.99999974E-6 : f32
    %46 = vector.broadcast %cst_22 : f32 to vector<64x1xf32>
    %47 = arith.addf %43, %46 : vector<64x1xf32>
    %48 = math.rsqrt %47 : vector<64x1xf32>
    %49 = vector.broadcast %48 : vector<64x1xf32> to vector<64x32xf32>
    %50 = arith.mulf %45, %49 : vector<64x32xf32>
    %51 = vector.broadcast %31 : vector<1x32xf32> to vector<64x32xf32>
    %52 = arith.mulf %50, %51 : vector<64x32xf32>
    %53 = vector.broadcast %32 : vector<1x32xf32> to vector<64x32xf32>
    %54 = arith.addf %52, %53 : vector<64x32xf32>
    %c0_23 = arith.constant 0 : index
    %c0_24 = arith.constant 0 : index
    %55 = vector.load %arg8[%c0_23, %c0_24] : memref<64x32xf32, #tpu.memory_space<vmem>>, vector<64x32xf32>
    %56 = arith.addf %54, %55 : vector<64x32xf32>
    %c0_25 = arith.constant 0 : index
    %c0_26 = arith.constant 0 : index
    %57 = vector.load %arg9[%c0_25, %c0_26] : memref<64x32xf32, #tpu.memory_space<vmem>>, vector<64x32xf32>
    tpu.vector_store %arg9[%c0_25, %c0_26], %56 {strides = array<i32>} : memref<64x32xf32, #tpu.memory_space<vmem>>, vector<64x32xf32>,
    return
  }
  func.func @transform_0(%arg0: i32) -> (i32, i32) {
    %c0_i32 = arith.constant 0 : i32
    %c0_i32_0 = arith.constant 0 : i32
    return %arg0, %c0_i32 : i32, i32
  }
  func.func @transform_1(%arg0: i32) -> (i32, i32) {
    %c0_i32 = arith.constant 0 : i32
    %c0_i32_0 = arith.constant 0 : i32
    %c0_i32_1 = arith.constant 0 : i32
    return %c0_i32, %c0_i32_0 : i32, i32
  }
  func.func @transform_2(%arg0: i32) -> (i32, i32) {
    %c0_i32 = arith.constant 0 : i32
    %c0_i32_0 = arith.constant 0 : i32
    %c0_i32_1 = arith.constant 0 : i32
    return %c0_i32, %c0_i32_0 : i32, i32
  }
  func.func @transform_3(%arg0: i32) -> (i32, i32) {
    %c0_i32 = arith.constant 0 : i32
    %c0_i32_0 = arith.constant 0 : i32
    %c0_i32_1 = arith.constant 0 : i32
    return %c0_i32, %c0_i32_0 : i32, i32
  }
  func.func @transform_4(%arg0: i32) -> (i32, i32) {
    %c0_i32 = arith.constant 0 : i32
    %c0_i32_0 = arith.constant 0 : i32
    %c0_i32_1 = arith.constant 0 : i32
    return %c0_i32, %c0_i32_0 : i32, i32
  }
  func.func @transform_5(%arg0: i32) -> (i32, i32) {
    %c0_i32 = arith.constant 0 : i32
    %c0_i32_0 = arith.constant 0 : i32
    %c0_i32_1 = arith.constant 0 : i32
    return %c0_i32, %c0_i32_0 : i32, i32
  }
  func.func @transform_6(%arg0: i32) -> (i32, i32) {
    %c0_i32 = arith.constant 0 : i32
    %c0_i32_0 = arith.constant 0 : i32
    %c0_i32_1 = arith.constant 0 : i32
    return %c0_i32, %c0_i32_0 : i32, i32
  }
  func.func @transform_7(%arg0: i32) -> (i32, i32) {
    %c0_i32 = arith.constant 0 : i32
    %c0_i32_0 = arith.constant 0 : i32
    %c0_i32_1 = arith.constant 0 : i32
    return %c0_i32, %c0_i32_0 : i32, i32
  }
  func.func @transform_8(%arg0: i32) -> (i32, i32) {
    %c0_i32 = arith.constant 0 : i32
    %c0_i32_0 = arith.constant 0 : i32
    return %arg0, %c0_i32 : i32, i32
  }
}

</mosaic_0001>

<bundles_post_ra>
// kernel: tpu_custom_call.1
= control target key start
LH: loop header
LB: loop body
LE: loop exit
PB: predicated region body
PF: predicated region fallthrough
CT: control target
= control target key end

     0   :  { %s898_s27 = smov 0   ;;  %s1098_s0 = inlined_call_operand.vmem [shape: f32[128,16], index: 0, kind: input, shape index: {}]   ;;  %s1099_s1 = inlined_call_operand.vmem [shape: f32[1,16], index: 1, kind: input, shape index: {}]   ;;  %s1100_s2 = inlined_call_operand.vmem [shape: f32[1,16], index: 2, kind: input, shape index: {}]   ;;  %s1101_s3 = inlined_call_operand.vmem [shape: bf16[16,32], index: 3, kind: input, shape index: {}]   ;;  %s1102_s4 = inlined_call_operand.vmem [shape: f32[1,32], index: 4, kind: input, shape index: {}]   ;;  %s1103_s5 = inlined_call_operand.vmem [shape: f32[1,32], index: 5, kind: input, shape index: {}]   ;;  %s1104_s6 = inlined_call_operand.vmem [shape: f32[1,32], index: 6, kind: input, shape index: {}]   ;;  %s1105_s7 = inlined_call_operand.vmem [shape: f32[64,32], index: 7, kind: input, shape index: {}]   ;;  %s1106_s8 = inlined_call_operand.vmem [shape: f32[128,32], index: 8, kind: output, shape index: {}]  }
   0x1 LB: > { %s766_s28 = sadd.s32 4294967295, %s851_s27   ;;  %p770_p0 = scmp.ge.s32.totalorder %s851_s27, 1  ;;  %s851_s27 = sphi %s898_s27, %s18_s27  }
   0x2   : > { %p263_p1 = scmp.lt.s32.totalorder %s851_s27, 3 }
   0x4   : > { %p264_p2 = pnand %p770_p0, %p263_p1 }
   0x5   : > { %s771_s29 = sshll.u32 (!%p264_p2), %s766_s28, 3 }
   0x6   : > { %267 = sbr.rel (%p264_p2) target bundleno = 859 (0x35b), region = 52  ;;  %p298_p3 = scmp.lt.s32.totalorder (!%p264_p2), %s771_s29, 15 }
   0xb   : > { %s1108_s29 = smov (!%p298_p3, %s771_s29), 15  ;;  %vm320_vm0 = vcmask 130048   ;;  %v812_v56 = vld [vmem:[%s1101_s3] sm:$0xff]   ;;  %vm552_vm1 = vcmask 261120  }
   0xc   : > { %s772_s30 = sshll.u32 %s1108_s29, 3  ;;  %792 = vmatprep.subr.bf16.mxu0 %v812_v56  ;;  %802 = vmatprep.subr.bf16.mxu1 %v812_v56 }
   0xd   : > { %s301_s11 = scalar_lea.vmem %s1098_s0, %s772_s30  ;;  %793 = vmatpush3.bf16.msra.mxu0 %v812_v56  ;;  %803 = vmatpush3.bf16.msra.mxu1 %v812_v56  ;;  %s1050_s9 = scalar_lea.vmem %s1106_s8, %s772_s30 }
   0xe   : > { %v310_v0 = vld [vmem:[%s301_s11] sm:$0xff]  ;;  %v311_v2 = vld [vmem:[%s301_s11 + $0x8] sm:$0xff]  ;;  %v312_v8 = vld [vmem:[%s301_s11 + $0x10] sm:$0xff] }
   0xf   : > { %v314_v1 = vld [vmem:[%s301_s11 + $0x20] sm:$0xff]  ;;  %v321_v3 = vsel %vm320_vm0, %v310_v0, 0.0  ;;  %v315_v5 = vld [vmem:[%s301_s11 + $0x28] sm:$0xff]  ;;  %v324_v6 = vsel %vm320_vm0, %v311_v2, 0.0  ;;  %v313_v9 = vld [vmem:[%s301_s11 + $0x18] sm:$0xff]  ;;  %v327_v10 = vsel %vm320_vm0, %v312_v8, 0.0 }
  0x10   : > { %v333_v4 = vsel %vm320_vm0, %v314_v1, 0.0  ;;  %322 = vadd.xlane.f32.xlu0 %v321_v3  ;;  %v336_v7 = vsel %vm320_vm0, %v315_v5, 0.0  ;;  %v330_v11 = vsel %vm320_vm0, %v313_v9, 0.0  ;;  %v316_v12 = vld [vmem:[%s301_s11 + $0x30] sm:$0xff]  ;;  %v317_v13 = vld [vmem:[%s301_s11 + $0x38] sm:$0xff] }
  0x11   : > { %334 = vadd.xlane.f32.xlu1 %v333_v4  ;;  %v339_v14 = vsel %vm320_vm0, %v316_v12, 0.0  ;;  %v342_v15 = vsel %vm320_vm0, %v317_v13, 0.0 }
  0x14   : > { %325 = vadd.xlane.f32.xlu0 %v324_v6 }
  0x15   : > { %337 = vadd.xlane.f32.xlu1 %v336_v7 }
  0x18   : > { %328 = vadd.xlane.f32.xlu0 %v327_v10 }
  0x19   : > { %331 = vadd.xlane.f32.xlu1 %v330_v11 }
  0x1c   : > { %340 = vadd.xlane.f32.xlu0 %v339_v14 }
  0x1d   : > { %343 = vadd.xlane.f32.xlu1 %v342_v15 }
  0x99   : > { %v323_v16 = vpop.xlane.xlu0 %322 }
  0x9a   : > { %v335_v17 = vpop.xlane.xlu1 %334  ;;  %v346_v18 = vmul.f32 0.0625, %v323_v16 }
  0x9b   : > { %v350_v19 = vmul.f32 0.0625, %v335_v17 }
  0x9c   : > { %v922_v20 = vsub.f32 %v310_v0, %v346_v18 }
  0x9d   : > { %v924_v21 = vsub.f32 %v314_v1, %v350_v19  ;;  %v326_v22 = vpop.xlane.xlu0 %325  ;;  %v775_v19 = vld [vmem:[%s1099_s1] ss:$0 sm:$0xff] }
  0x9e   : > { %v338_v23 = vpop.xlane.xlu1 %337  ;;  %v347_v24 = vmul.f32 0.0625, %v326_v22  ;;  %v362_v26 = vmul.f32 %v922_v20, %v922_v20 }
  0x9f   : > { %v351_v25 = vmul.f32 0.0625, %v338_v23  ;;  %v366_v27 = vmul.f32 %v924_v21, %v924_v21 }
  0xa0   : > { %v930_v28 = vsub.f32 %v311_v2, %v347_v24  ;;  %v370_v30 = vsel %vm320_vm0, %v362_v26, 0.0  ;;  %v776_v26 = vld [vmem:[%s1100_s2] ss:$0 sm:$0xff] }
  0xa1   : > { %v932_v29 = vsub.f32 %v315_v5, %v351_v25  ;;  %371 = vadd.xlane.f32.xlu0 %v370_v30  ;;  %v329_v31 = vpop.xlane.xlu0 %328  ;;  %v382_v33 = vsel %vm320_vm0, %v366_v27, 0.0 }
  0xa2   : > { %v332_v32 = vpop.xlane.xlu1 %331  ;;  %v348_v34 = vmul.f32 0.0625, %v329_v31  ;;  %v363_v36 = vmul.f32 %v930_v28, %v930_v28 }
  0xa3   : > { %v349_v35 = vmul.f32 0.0625, %v332_v32  ;;  %v367_v37 = vmul.f32 %v932_v29, %v932_v29 }
  0xa4   : > { %v940_v38 = vsub.f32 %v312_v8, %v348_v34  ;;  %v373_v40 = vsel %vm320_vm0, %v363_v36, 0.0 }
  0xa5   : > { %v942_v39 = vsub.f32 %v313_v9, %v349_v35  ;;  %383 = vadd.xlane.f32.xlu0 %v382_v33  ;;  %374 = vadd.xlane.f32.xlu1 %v373_v40  ;;  %v341_v41 = vpop.xlane.xlu0 %340  ;;  %v385_v43 = vsel %vm320_vm0, %v367_v37, 0.0 }
  0xa6   : > { %v344_v42 = vpop.xlane.xlu1 %343  ;;  %v352_v44 = vmul.f32 0.0625, %v341_v41  ;;  %v364_v46 = vmul.f32 %v940_v38, %v940_v38 }
  0xa7   : > { %v353_v45 = vmul.f32 0.0625, %v344_v42  ;;  %v365_v47 = vmul.f32 %v942_v39, %v942_v39 }
  0xa8   : > { %v950_v48 = vsub.f32 %v316_v12, %v352_v44  ;;  %v376_v50 = vsel %vm320_vm0, %v364_v46, 0.0 }
  0xa9   : > { %v952_v49 = vsub.f32 %v317_v13, %v353_v45  ;;  %386 = vadd.xlane.f32.xlu1 %v385_v43  ;;  %377 = vadd.xlane.f32.xlu0 %v376_v50  ;;  %v379_v51 = vsel %vm320_vm0, %v365_v47, 0.0 }
  0xaa   : > { %v368_v52 = vmul.f32 %v950_v48, %v950_v48 }
  0xab   : > { %v369_v53 = vmul.f32 %v952_v49, %v952_v49 }
  0xac   : > { %v388_v54 = vsel %vm320_vm0, %v368_v52, 0.0 }
  0xad   : > { %380 = vadd.xlane.f32.xlu1 %v379_v51  ;;  %389 = vadd.xlane.f32.xlu0 %v388_v54  ;;  %v391_v55 = vsel %vm320_vm0, %v369_v53, 0.0 }
  0xb1   : > { %392 = vadd.xlane.f32.xlu1 %v391_v55 }
 0x12a   : > { %v372_v57 = vpop.xlane.xlu0 %371 }
 0x12b   : > { %v394_v58 = vmul.f32 0.0625, %v372_v57 }
 0x12d   : > { %v402_v59 = vadd.f32 1e-05, %v394_v58 }
 0x12e   : > { %v375_v60 = vpop.xlane.xlu1 %374  ;;  %v384_v61 = vpop.xlane.xlu0 %383 }
 0x12f   : > { %813 = vrsqrt.f32 %v402_v59  ;;  %v395_v62 = vmul.f32 0.0625, %v375_v60  ;;  %v398_v63 = vmul.f32 0.0625, %v384_v61 }
 0x131   : > { %v403_v0 = vadd.f32 1e-05, %v395_v62  ;;  %v406_v1 = vadd.f32 1e-05, %v398_v63 }
 0x132   : > { %v387_v2 = vpop.xlane.xlu1 %386  ;;  %v378_v3 = vpop.xlane.xlu0 %377 }
 0x133   : > { %815 = vrsqrt.f32 %v403_v0  ;;  %v399_v4 = vmul.f32 0.0625, %v387_v2  ;;  %v396_v5 = vmul.f32 0.0625, %v378_v3 }
 0x134   : > { %817 = vrsqrt.f32 %v406_v1 }
 0x135   : > { %v407_v6 = vadd.f32 1e-05, %v399_v4  ;;  %v404_v7 = vadd.f32 1e-05, %v396_v5 }
 0x136   : > { %v381_v8 = vpop.xlane.xlu1 %380  ;;  %v390_v9 = vpop.xlane.xlu0 %389 }
 0x137   : > { %819 = vrsqrt.f32 %v407_v6  ;;  %v397_v10 = vmul.f32 0.0625, %v381_v8  ;;  %v400_v11 = vmul.f32 0.0625, %v390_v9 }
 0x138   : > { %821 = vrsqrt.f32 %v404_v7 }
 0x139   : > { %v405_v12 = vadd.f32 1e-05, %v397_v10  ;;  %v408_v13 = vadd.f32 1e-05, %v400_v11 }
 0x13a   : > { %v393_v14 = vpop.xlane.xlu1 %392 }
 0x13b   : > { %823 = vrsqrt.f32 %v405_v12  ;;  %v401_v15 = vmul.f32 0.0625, %v393_v14 }
 0x13c   : > { %v814_v16 = vpop.eup %813  ;;  %825 = vrsqrt.f32 %v408_v13 }
 0x13d   : > { %v409_v17 = vadd.f32 1e-05, %v401_v15  ;;  %v418_v18 = vmul.f32 %v814_v16, %v922_v20 }
 0x13f   : > { %827 = vrsqrt.f32 %v409_v17  ;;  %v432_v25 = vmul.f32 %v775_v19, %v418_v18 }
 0x140   : > { %v816_v22 = vpop.eup %815 }
 0x141   : > { %v818_v23 = vpop.eup %817  ;;  %v419_v24 = vmul.f32 %v816_v22, %v930_v28  ;;  %v446_v20 = vadd.f32 %v776_v26, %v432_v25 }
 0x142   : > { %v422_v27 = vmul.f32 %v818_v23, %v924_v21 }
 0x143   : > { %v433_v30 = vmul.f32 %v775_v19, %v419_v24 }
 0x144   : > { %v820_v31 = vpop.eup %819  ;;  %v436_v35 = vmul.f32 %v775_v19, %v422_v27 }
 0x145   : > { %v822_v32 = vpop.eup %821  ;;  %v447_v33 = vadd.f32 %v776_v26, %v433_v30  ;;  %v423_v34 = vmul.f32 %v820_v31, %v932_v29 }
 0x146   : > { %v420_v36 = vmul.f32 %v822_v32, %v940_v38  ;;  %v450_v42 = vadd.f32 %v776_v26, %v436_v35 }
 0x147   : > { %v454_v37 = vpack.c.bf16 %v447_v33, %v446_v20  ;;  %v437_v40 = vmul.f32 %v775_v19, %v423_v34 }
 0x148   : > { %v824_v28 = vpop.eup %823  ;;  %v434_v44 = vmul.f32 %v775_v19, %v420_v36 }
 0x149   : > { %v826_v41 = vpop.eup %825  ;;  %794 = vmatprep.mubr.msk.bf16.mxu0 %vm320_vm0, %v454_v37  ;;  %v451_v43 = vadd.f32 %v776_v26, %v437_v40  ;;  %v421_v21 = vmul.f32 %v824_v28, %v942_v39 }
 0x14a   : > { %v424_v45 = vmul.f32 %v826_v41, %v950_v48  ;;  %v448_v29 = vadd.f32 %v776_v26, %v434_v44  ;;  %v777_v48 = vld [vmem:[%s1102_s4] ss:$0 sm:$0xff] }
 0x14b   : > { %v456_v46 = vpack.c.bf16 %v451_v43, %v450_v42  ;;  %v435_v47 = vmul.f32 %v775_v19, %v421_v21 }
 0x14c   : > { %v828_v50 = vpop.eup %827  ;;  %v438_v52 = vmul.f32 %v775_v19, %v424_v45 }
 0x14d   : > { %798 = vmatprep.mubr.msk.bf16.mxu1 %vm320_vm0, %v456_v46  ;;  %v449_v38 = vadd.f32 %v776_v26, %v435_v47  ;;  %v425_v51 = vmul.f32 %v828_v50, %v952_v49 }
 0x14e   : > { %v452_v55 = vadd.f32 %v776_v26, %v438_v52 }
 0x14f   : > { %v455_v53 = vpack.c.bf16 %v449_v38, %v448_v29  ;;  %v439_v54 = vmul.f32 %v775_v19, %v425_v51 }
 0x151   : > { %795 = vmatmul.mubr.msk.bf16.vlgmr.msra.gmra.mxu0 %vm320_vm0, %v455_v53  ;;  %v453_v56 = vadd.f32 %v776_v26, %v439_v54 }
 0x153   : > { %v457_v39 = vpack.c.bf16 %v453_v56, %v452_v55 }
 0x155   : > { %799 = vmatmul.mubr.msk.bf16.vlgmr.msra.gmra.mxu1 %vm320_vm0, %v457_v39 }
 0x211   : > { %v796_v57 = vpop.f32.mrf.mxu0 }
 0x212   : > { %v528_v58 = vadd.f32 %v796_v57, %v777_v48 }
 0x213   : > { %v519_v59 = vpop.f32.mrf.mxu0 }
 0x214   : > { %v520_v60 = vadd.f32 %v777_v48, %v519_v59  ;;  %v559_v49 = vsel %vm552_vm1, %v528_v58, 0.0 }
 0x215   : > { %560 = vadd.xlane.f32.xlu0 %v559_v49  ;;  %v797_v61 = vpop.f32.mrf.mxu0  ;;  %v800_v62 = vpop.f32.mrf.mxu1 }
 0x216   : > { %v531_v63 = vadd.f32 %v797_v61, %v777_v48  ;;  %v553_v5 = vsel %vm552_vm1, %v520_v60, 0.0  ;;  %v544_v8 = vadd.f32 %v800_v62, %v777_v48 }
 0x217   : > { %v522_v0 = vpop.f32.mrf.mxu0  ;;  %v535_v1 = vpop.f32.mrf.mxu1 }
 0x218   : > { %v523_v2 = vadd.f32 %v777_v48, %v522_v0  ;;  %v536_v3 = vadd.f32 %v777_v48, %v535_v1  ;;  %v562_v4 = vsel %vm552_vm1, %v531_v63, 0.0  ;;  %v571_v14 = vsel %vm552_vm1, %v544_v8, 0.0 }
 0x219   : > { %563 = vadd.xlane.f32.xlu1 %v562_v4  ;;  %554 = vadd.xlane.f32.xlu0 %v553_v5  ;;  %v801_v6 = vpop.f32.mrf.mxu1 }
 0x21a   : > { %v556_v10 = vsel %vm552_vm1, %v523_v2, 0.0  ;;  %v565_v11 = vsel %vm552_vm1, %v536_v3, 0.0  ;;  %v547_v12 = vadd.f32 %v801_v6, %v777_v48 }
 0x21b   : > { %v538_v7 = vpop.f32.mrf.mxu1 }
 0x21c   : > { %v539_v9 = vadd.f32 %v777_v48, %v538_v7  ;;  %v574_v15 = vsel %vm552_vm1, %v547_v12, 0.0 }
 0x21d   : > { %557 = vadd.xlane.f32.xlu1 %v556_v10  ;;  %566 = vadd.xlane.f32.xlu0 %v565_v11 }
 0x21e   : > { %v568_v13 = vsel %vm552_vm1, %v539_v9, 0.0 }
 0x221   : > { %569 = vadd.xlane.f32.xlu1 %v568_v13  ;;  %572 = vadd.xlane.f32.xlu0 %v571_v14 }
 0x225   : > { %575 = vadd.xlane.f32.xlu1 %v574_v15 }
 0x29e   : > { %v561_v16 = vpop.xlane.xlu0 %560 }
 0x29f   : > { %v580_v17 = vmul.f32 0.03125, %v561_v16  ;;  %v783_v16 = vld [vmem:[%s1103_s5] ss:$0 sm:$0xff] }
 0x2a1   : > { %v994_v18 = vsub.f32 %v528_v58, %v580_v17 }
 0x2a2   : > { %v564_v19 = vpop.xlane.xlu1 %563  ;;  %v555_v22 = vpop.xlane.xlu0 %554 }
 0x2a3   : > { %v581_v23 = vmul.f32 0.03125, %v564_v19  ;;  %v578_v24 = vmul.f32 0.03125, %v555_v22  ;;  %v596_v25 = vmul.f32 %v994_v18, %v994_v18  ;;  %v784_v22 = vld [vmem:[%s1104_s6] ss:$0 sm:$0xff] }
 0x2a5   : > { %v998_v26 = vsub.f32 %v531_v63, %v581_v23  ;;  %v1000_v27 = vsub.f32 %v520_v60, %v578_v24  ;;  %v608_v30 = vsel %vm552_vm1, %v596_v25, 0.0  ;;  %v688_v25 = vld [vmem:[%s1105_s7 + $0x10] sm:$0xff] }
 0x2a6   : > { %v558_v31 = vpop.xlane.xlu1 %557  ;;  %609 = vadd.xlane.f32.xlu0 %v608_v30  ;;  %v567_v32 = vpop.xlane.xlu0 %566 }
 0x2a7   : > { %v579_v20 = vmul.f32 0.03125, %v558_v31  ;;  %v582_v33 = vmul.f32 0.03125, %v567_v32  ;;  %v597_v34 = vmul.f32 %v998_v26, %v998_v26  ;;  %v594_v35 = vmul.f32 %v1000_v27, %v1000_v27 }
 0x2a9   : > { %v1007_v36 = vsub.f32 %v523_v2, %v579_v20  ;;  %v1009_v37 = vsub.f32 %v536_v3, %v582_v33  ;;  %v611_v40 = vsel %vm552_vm1, %v597_v34, 0.0  ;;  %v602_v28 = vsel %vm552_vm1, %v594_v35, 0.0  ;;  %v689_v35 = vld [vmem:[%s1105_s7 + $0x18] sm:$0xff] }
 0x2aa   : > { %612 = vadd.xlane.f32.xlu1 %v611_v40  ;;  %v570_v41 = vpop.xlane.xlu1 %569  ;;  %603 = vadd.xlane.f32.xlu0 %v602_v28  ;;  %v573_v42 = vpop.xlane.xlu0 %572 }
 0x2ab   : > { %v583_v43 = vmul.f32 0.03125, %v570_v41  ;;  %v584_v21 = vmul.f32 0.03125, %v573_v42  ;;  %v595_v44 = vmul.f32 %v1007_v36, %v1007_v36  ;;  %v598_v45 = vmul.f32 %v1009_v37, %v1009_v37  ;;  %v686_v41 = vld [vmem:[%s1105_s7] sm:$0xff] }
 0x2ad   : > { %v1017_v46 = vsub.f32 %v539_v9, %v583_v43  ;;  %v1019_v47 = vsub.f32 %v544_v8, %v584_v21  ;;  %v605_v50 = vsel %vm552_vm1, %v595_v44, 0.0  ;;  %v614_v29 = vsel %vm552_vm1, %v598_v45, 0.0 }
 0x2ae   : > { %606 = vadd.xlane.f32.xlu1 %v605_v50  ;;  %v576_v38 = vpop.xlane.xlu1 %575  ;;  %615 = vadd.xlane.f32.xlu0 %v614_v29  ;;  %v687_v29 = vld [vmem:[%s1105_s7 + $0x8] sm:$0xff] }
 0x2af   : > { %v585_v51 = vmul.f32 0.03125, %v576_v38  ;;  %v599_v52 = vmul.f32 %v1017_v46, %v1017_v46  ;;  %v600_v53 = vmul.f32 %v1019_v47, %v1019_v47 }
 0x2b1   : > { %v1027_v54 = vsub.f32 %v547_v12, %v585_v51  ;;  %v617_v55 = vsel %vm552_vm1, %v599_v52, 0.0  ;;  %v620_v56 = vsel %vm552_vm1, %v600_v53, 0.0 }
 0x2b2   : > { %618 = vadd.xlane.f32.xlu1 %v617_v55  ;;  %621 = vadd.xlane.f32.xlu0 %v620_v56 }
 0x2b3   : > { %v601_v39 = vmul.f32 %v1027_v54, %v1027_v54 }
 0x2b5   : > { %v623_v48 = vsel %vm552_vm1, %v601_v39, 0.0 }
 0x2b6   : > { %624 = vadd.xlane.f32.xlu1 %v623_v48 }
 0x32f   : > { %v610_v57 = vpop.xlane.xlu0 %609 }
 0x330   : > { %v628_v58 = vmul.f32 0.03125, %v610_v57 }
 0x332   : > { %v636_v59 = vadd.f32 1e-05, %v628_v58  ;;  %v691_v58 = vld [vmem:[%s1105_s7 + $0x28] sm:$0xff] }
 0x333   : > { %v613_v60 = vpop.xlane.xlu1 %612  ;;  %v604_v49 = vpop.xlane.xlu0 %603 }
 0x334   : > { %829 = vrsqrt.f32 %v636_v59  ;;  %v629_v61 = vmul.f32 0.03125, %v613_v60  ;;  %v626_v62 = vmul.f32 0.03125, %v604_v49  ;;  %v692_v60 = vld [vmem:[%s1105_s7 + $0x30] sm:$0xff] }
 0x336   : > { %v637_v63 = vadd.f32 1e-05, %v629_v61  ;;  %v634_v0 = vadd.f32 1e-05, %v626_v62 }
 0x337   : > { %v607_v1 = vpop.xlane.xlu1 %606  ;;  %v616_v2 = vpop.xlane.xlu0 %615 }
 0x338   : > { %831 = vrsqrt.f32 %v637_v63  ;;  %v627_v3 = vmul.f32 0.03125, %v607_v1  ;;  %v630_v4 = vmul.f32 0.03125, %v616_v2 }
 0x339   : > { %833 = vrsqrt.f32 %v634_v0  ;;  %v693_v0 = vld [vmem:[%s1105_s7 + $0x38] sm:$0xff] }
 0x33a   : > { %v635_v5 = vadd.f32 1e-05, %v627_v3  ;;  %v638_v6 = vadd.f32 1e-05, %v630_v4 }
 0x33b   : > { %v619_v7 = vpop.xlane.xlu1 %618  ;;  %v622_v8 = vpop.xlane.xlu0 %621 }
 0x33c   : > { %835 = vrsqrt.f32 %v635_v5  ;;  %v631_v9 = vmul.f32 0.03125, %v619_v7  ;;  %v632_v10 = vmul.f32 0.03125, %v622_v8 }
 0x33d   : > { %837 = vrsqrt.f32 %v638_v6 }
 0x33e   : > { %v639_v11 = vadd.f32 1e-05, %v631_v9  ;;  %v640_v12 = vadd.f32 1e-05, %v632_v10 }
 0x33f   : > { %v625_v13 = vpop.xlane.xlu1 %624 }
 0x340   : > { %839 = vrsqrt.f32 %v639_v11  ;;  %v633_v14 = vmul.f32 0.03125, %v625_v13 }
 0x341   : > { %v830_v15 = vpop.eup %829  ;;  %841 = vrsqrt.f32 %v640_v12 }
 0x342   : > { %v652_v17 = vmul.f32 %v830_v15, %v994_v18  ;;  %v641_v19 = vadd.f32 1e-05, %v633_v14 }
 0x344   : > { %v666_v23 = vmul.f32 %v783_v16, %v652_v17  ;;  %843 = vrsqrt.f32 %v641_v19 }
 0x345   : > { %v832_v24 = vpop.eup %831 }
 0x346   : > { %v834_v30 = vpop.eup %833  ;;  %v680_v31 = vadd.f32 %v784_v22, %v666_v23  ;;  %v653_v32 = vmul.f32 %v832_v24, %v998_v26 }
 0x347   : > { %v650_v18 = vmul.f32 %v834_v30, %v1000_v27 }
 0x348   : > { %v696_v20 = vadd.f32 %v688_v25, %v680_v31  ;;  %v667_v33 = vmul.f32 %v783_v16, %v653_v32 }
 0x349   : > { %v836_v34 = vpop.eup %835  ;;  %v664_v40 = vmul.f32 %v783_v16, %v650_v18 }
 0x34a   : > { %v838_v28 = vpop.eup %837  ;;  %704 = vst.msk [vmem:[%s1050_s9 + $0x10] sm:$0xff] %vm552_vm1, %v696_v20  ;;  %v681_v26 = vadd.f32 %v784_v22, %v667_v33  ;;  %v651_v27 = vmul.f32 %v836_v34, %v1007_v36  ;;  %v690_v36 = vld [vmem:[%s1105_s7 + $0x20] sm:$0xff] }
 0x34b   : > { %v678_v42 = vadd.f32 %v784_v22, %v664_v40  ;;  %v654_v43 = vmul.f32 %v838_v28, %v1009_v37 }
 0x34c   : > { %v697_v21 = vadd.f32 %v689_v35, %v681_v26  ;;  %v665_v44 = vmul.f32 %v783_v16, %v651_v27 }
 0x34d   : > { %v840_v45 = vpop.eup %839  ;;  %v694_v50 = vadd.f32 %v686_v41, %v678_v42  ;;  %v668_v38 = vmul.f32 %v783_v16, %v654_v43 }
 0x34e   : > { %v842_v51 = vpop.eup %841  ;;  %705 = vst.msk [vmem:[%s1050_s9 + $0x18] sm:$0xff] %vm552_vm1, %v697_v21  ;;  %v679_v52 = vadd.f32 %v784_v22, %v665_v44  ;;  %v655_v37 = vmul.f32 %v840_v45, %v1017_v46 }
 0x34f   : > { %702 = vst.msk [vmem:[%s1050_s9] sm:$0xff] %vm552_vm1, %v694_v50  ;;  %v682_v53 = vadd.f32 %v784_v22, %v668_v38  ;;  %v656_v55 = vmul.f32 %v842_v51, %v1019_v47 }
 0x350   : > { %v695_v56 = vadd.f32 %v687_v29, %v679_v52  ;;  %v669_v39 = vmul.f32 %v783_v16, %v655_v37 }
 0x351   : > { %v844_v48 = vpop.eup %843  ;;  %v698_v57 = vadd.f32 %v690_v36, %v682_v53  ;;  %v670_v59 = vmul.f32 %v783_v16, %v656_v55 }
 0x352   : > { %703 = vst.msk [vmem:[%s1050_s9 + $0x8] sm:$0xff] %vm552_vm1, %v695_v56  ;;  %v683_v46 = vadd.f32 %v784_v22, %v669_v39  ;;  %v657_v47 = vmul.f32 %v844_v48, %v1027_v54 }
 0x353   : > { %706 = vst.msk [vmem:[%s1050_s9 + $0x20] sm:$0xff] %vm552_vm1, %v698_v57  ;;  %v684_v49 = vadd.f32 %v784_v22, %v670_v59 }
 0x354   : > { %v699_v61 = vadd.f32 %v691_v58, %v683_v46  ;;  %v671_v62 = vmul.f32 %v783_v16, %v657_v47 }
 0x355   : > { %v700_v63 = vadd.f32 %v692_v60, %v684_v49 }
 0x356   : > { %707 = vst.msk [vmem:[%s1050_s9 + $0x28] sm:$0xff] %vm552_vm1, %v699_v61  ;;  %v685_v1 = vadd.f32 %v784_v22, %v671_v62 }
 0x357   : > { %708 = vst.msk [vmem:[%s1050_s9 + $0x30] sm:$0xff] %vm552_vm1, %v700_v63 }
 0x358   : > { %v701_v2 = vadd.f32 %v693_v0, %v685_v1 }
 0x35a   : > { %709 = vst.msk [vmem:[%s1050_s9 + $0x38] sm:$0xff] %vm552_vm1, %v701_v2 }
 0x35b PF: > { %s18_s27 = sadd.s32 1, %s851_s27  }
 0x35c   : > { %p15_p4 = scmp.ge.s32.totalorder %s18_s27, 4  }
 0x35e   :  { %17 = sbr.rel (!%p15_p4) target bundleno = 1 (0x1), region = 82 }

</bundles_post_ra>
